<compile_context>
chip_gen: v5e
topology: v5e:2x2
jax: 0.10.0
libtpu: 0.0.40
codegen_flags: <defaults>
</compile_context>

<pallas_src>
import functools

import jax
import jax.numpy as jnp
from jax.experimental import pallas as pl
from jax.experimental.pallas import tpu as pltpu


_LANES = 128          # lane width: output columns are padded to this
_FMA_MAX_K = 32       # below this in_size, do the first layer on the VPU


def _round_up(x, m):
    return ((x + m - 1) // m) * m


def _mlp_kernel(x_ref, w1_ref, b1_ref, w2_ref, b2_ref, o_ref):
    in_size = x_ref.shape[1]

    # ---- hidden layer: Linear + Tanh ------------------------------------
    if in_size < _FMA_MAX_K:
        # Tiny K: an MXU matmul would use ~1-2% of the systolic array and pay
        # push/pop latency.  Unrolled broadcast FMAs on the VPU are cheaper.
        acc = x_ref[:, 0:1] * w1_ref[0:1, :] + b1_ref[...]
        for k in range(1, in_size):
            acc = acc + x_ref[:, k:k + 1] * w1_ref[k:k + 1, :]
    else:
        acc = jnp.dot(x_ref[...], w1_ref[...],
                      preferred_element_type=jnp.float32) + b1_ref[...]
    h = jnp.tanh(acc)

    # ---- output layer: Linear + Sigmoid ----------------------------------
    z = jnp.dot(h, w2_ref[...], preferred_element_type=jnp.float32)
    z = z + b2_ref[...]
    o_ref[...] = 1.0 / (1.0 + jnp.exp(-z))   # sigmoid (exact, f32)


def nnet_forward(x, w1, b1, w2, b2, *, tile_b=512):
    """Pallas implementation of NNet.forward.

    x:  (B, in_size)      f32
    w1: (in_size, hidden) f32   (transposed PyTorch Linear weight)
    b1: (1, hidden)       f32
    w2: (hidden, out)     f32
    b2: (1, out)          f32
    returns (B, out)      f32
    """
    B, in_size = x.shape
    hidden = w1.shape[1]
    out_size = w2.shape[1]

    # --- lane-dense output: zero-pad output columns to a multiple of 128 ---
    out_pad = _round_up(max(out_size, _LANES), _LANES)
    w2p = jnp.pad(w2, ((0, 0), (0, out_pad - out_size)))
    b2p = jnp.pad(b2, ((0, 0), (0, out_pad - out_size)))

    # --- batch tiling: big tiles when B is big, one tile when B is small ---
    tile_b = min(tile_b, _round_up(B, 8))
    b_pad = _round_up(B, tile_b)
    if b_pad != B:
        x = jnp.pad(x, ((0, b_pad - B), (0, 0)))
    grid = (b_pad // tile_b,)

    resident = lambda shape: pl.BlockSpec(shape, lambda i: (0, 0))

    cost = pl.CostEstimate(
        flops=2 * b_pad * in_size * hidden + 2 * b_pad * hidden * out_pad,
        transcendentals=b_pad * hidden + b_pad * out_pad,
        bytes_accessed=4 * (b_pad * in_size + in_size * hidden + hidden
                            + hidden * out_pad + out_pad + b_pad * out_pad),
    )

    out = pl.pallas_call(
        _mlp_kernel,
        out_shape=jax.ShapeDtypeStruct((b_pad, out_pad), jnp.float32),
        grid=grid,
        in_specs=[
            pl.BlockSpec((tile_b, in_size), lambda i: (i, 0)),   # X tile
            resident(w1.shape),                                  # W1 resident
            resident(b1.shape),                                  # b1 resident
            resident(w2p.shape),                                 # W2 resident
            resident(b2p.shape),                                 # b2 resident
        ],
        out_specs=pl.BlockSpec((tile_b, out_pad), lambda i: (i, 0)),
        compiler_params=pltpu.CompilerParams(
            dimension_semantics=("parallel",),
            vmem_limit_bytes=32 * 1024 * 1024,
        ),
        cost_estimate=cost,
    )(x, w1, b1, w2p, b2p)

    return out[:B, :out_size]


def init_params(key, in_size, hidden_size, out_size):
    """Deterministic init mirroring nn.Linear's U(-1/sqrt(fan_in), 1/sqrt(fan_in))."""
    k1, k2, k3, k4 = jax.random.split(key, 4)
    bound1 = 1.0 / jnp.sqrt(jnp.float32(in_size))
    bound2 = 1.0 / jnp.sqrt(jnp.float32(hidden_size))
    # PyTorch stores weight as (out, in); build that way then transpose.
    w1_pt = jax.random.uniform(k1, (hidden_size, in_size), jnp.float32, -bound1, bound1)
    b1 = jax.random.uniform(k2, (hidden_size,), jnp.float32, -bound1, bound1)
    w2_pt = jax.random.uniform(k3, (out_size, hidden_size), jnp.float32, -bound2, bound2)
    b2 = jax.random.uniform(k4, (out_size,), jnp.float32, -bound2, bound2)
    return (
        w1_pt.T,                      # (in, hidden)
        b1.reshape(1, hidden_size),
        w2_pt.T,                      # (hidden, out)
        b2.reshape(1, out_size),
    )


def reference_forward(x, w1, b1, w2, b2):
    h = jnp.tanh(x @ w1 + b1)
    return jax.nn.sigmoid(h @ w2 + b2)


if __name__ == "__main__":
    # Dataset in the lab has 2 input features (df.iloc[:, 0:2]); typical lab
    # config: in_size=2, hidden_size=32, out_size=1.
    in_size, hidden_size, out_size = 2, 32, 1

    key = jax.random.PRNGKey(0)
    kx, kp, kx2 = jax.random.split(key, 3)
    w1, b1, w2, b2 = init_params(kp, in_size, hidden_size, out_size)

    # Small batch (single tile).
    batch = 8
    x = jax.random.normal(kx, (batch, in_size), jnp.float32)
    out = jax.block_until_ready(nnet_forward(x, w1, b1, w2, b2))
    ref = reference_forward(x, w1, b1, w2, b2)
    assert out.shape == (batch, out_size)
    assert jnp.allclose(out, ref, atol=1e-5, rtol=1e-5)

    # Larger batch: exercises the batch grid (2 tiles of 512) + padding path.
    batch2 = 700
    x2 = jax.random.normal(kx2, (batch2, in_size), jnp.float32)
    out2 = jax.block_until_ready(nnet_forward(x2, w1, b1, w2, b2))
    ref2 = reference_forward(x2, w1, b1, w2, b2)
    assert out2.shape == (batch2, out_size)
    assert jnp.allclose(out2, ref2, atol=1e-5, rtol=1e-5)

    print("KERNEL_OK")
</pallas_src>

<mosaic_0001>
module attributes {stable_mosaic.version = 11 : i64} {
  func.func @_mlp_kernel(%arg0: i32, %arg1: memref<8x2xf32, #tpu.memory_space<vmem>>, %arg2: memref<2x32xf32, #tpu.memory_space<vmem>>, %arg3: memref<1x32xf32, #tpu.memory_space<vmem>>, %arg4: memref<32x128xf32, #tpu.memory_space<vmem>>, %arg5: memref<1x128xf32, #tpu.memory_space<vmem>>, %arg6: memref<8x128xf32, #tpu.memory_space<vmem>>) attributes {dimension_semantics = [#tpu.dimension_semantics<parallel>], iteration_bounds = array<i64: 1>, scalar_prefetch = 0 : i64, scratch_operands = 0 : i64, tpu.core_type = #tpu.core_type<tc>, window_params = [{transform_indices = @transform_0, window_bounds = array<i64: 8, 2>}, {pipeline_mode = #tpu.pipeline_mode<synchronous>, transform_indices = @transform_1, window_bounds = array<i64: 2, 32>}, {pipeline_mode = #tpu.pipeline_mode<synchronous>, transform_indices = @transform_2, window_bounds = array<i64: 1, 32>}, {pipeline_mode = #tpu.pipeline_mode<synchronous>, transform_indices = @transform_3, window_bounds = array<i64: 32, 128>}, {pipeline_mode = #tpu.pipeline_mode<synchronous>, transform_indices = @transform_4, window_bounds = array<i64: 1, 128>}, {transform_indices = @transform_5, window_bounds = array<i64: 8, 128>}]} {
    %c0 = arith.constant 0 : index
    %c0_0 = arith.constant 0 : index
    %0 = vector.load %arg1[%c0, %c0_0] : memref<8x2xf32, #tpu.memory_space<vmem>>, vector<8x1xf32>
    %c0_1 = arith.constant 0 : index
    %c0_2 = arith.constant 0 : index
    %1 = vector.load %arg2[%c0_1, %c0_2] : memref<2x32xf32, #tpu.memory_space<vmem>>, vector<1x32xf32>
    %2 = vector.broadcast %0 : vector<8x1xf32> to vector<8x32xf32>
    %3 = vector.broadcast %1 : vector<1x32xf32> to vector<8x32xf32>
    %4 = arith.mulf %2, %3 : vector<8x32xf32>
    %c0_3 = arith.constant 0 : index
    %c0_4 = arith.constant 0 : index
    %5 = vector.load %arg3[%c0_3, %c0_4] : memref<1x32xf32, #tpu.memory_space<vmem>>, vector<1x32xf32>
    %6 = vector.broadcast %5 : vector<1x32xf32> to vector<8x32xf32>
    %7 = arith.addf %4, %6 : vector<8x32xf32>
    %c0_5 = arith.constant 0 : index
    %c1 = arith.constant 1 : index
    %8 = vector.load %arg1[%c0_5, %c1] : memref<8x2xf32, #tpu.memory_space<vmem>>, vector<8x1xf32>
    %c1_6 = arith.constant 1 : index
    %c0_7 = arith.constant 0 : index
    %9 = vector.load %arg2[%c1_6, %c0_7] : memref<2x32xf32, #tpu.memory_space<vmem>>, vector<1x32xf32>
    %10 = vector.broadcast %8 : vector<8x1xf32> to vector<8x32xf32>
    %11 = vector.broadcast %9 : vector<1x32xf32> to vector<8x32xf32>
    %12 = arith.mulf %10, %11 : vector<8x32xf32>
    %13 = arith.addf %7, %12 : vector<8x32xf32>
    %14 = math.tanh %13 : vector<8x32xf32>
    %c0_8 = arith.constant 0 : index
    %c0_9 = arith.constant 0 : index
    %15 = vector.load %arg4[%c0_8, %c0_9] : memref<32x128xf32, #tpu.memory_space<vmem>>, vector<32x128xf32>
    %cst = arith.constant dense<0.000000e+00> : vector<8x128xf32>
    %16 = tpu.matmul %14, %15, %cst {dimension_numbers = #tpu.dot_dimension_numbers<[1], [0], [0], [1], [0, 0, 1, 1], [], []>} : vector<8x32xf32>, vector<32x128xf32>, vector<8x128xf32> -> vector<8x128xf32>
    %c0_10 = arith.constant 0 : index
    %c0_11 = arith.constant 0 : index
    %17 = vector.load %arg5[%c0_10, %c0_11] : memref<1x128xf32, #tpu.memory_space<vmem>>, vector<1x128xf32>
    %18 = vector.broadcast %17 : vector<1x128xf32> to vector<8x128xf32>
    %19 = arith.addf %16, %18 : vector<8x128xf32>
    %cst_12 = arith.constant 0.000000e+00 : f32
    %20 = vector.broadcast %cst_12 : f32 to vector<8x128xf32>
    %21 = arith.subf %20, %19 : vector<8x128xf32>
    %22 = math.exp %21 : vector<8x128xf32>
    %cst_13 = arith.constant 1.000000e+00 : f32
    %23 = vector.broadcast %cst_13 : f32 to vector<8x128xf32>
    %24 = arith.addf %23, %22 : vector<8x128xf32>
    %cst_14 = arith.constant 1.000000e+00 : f32
    %25 = vector.broadcast %cst_14 : f32 to vector<8x128xf32>
    %26 = arith.divf %25, %24 : vector<8x128xf32>
    %c0_15 = arith.constant 0 : index
    %c0_16 = arith.constant 0 : index
    %27 = vector.load %arg6[%c0_15, %c0_16] : memref<8x128xf32, #tpu.memory_space<vmem>>, vector<8x128xf32>
    tpu.vector_store %arg6[%c0_15, %c0_16], %26 {strides = array<i32>} : memref<8x128xf32, #tpu.memory_space<vmem>>, vector<8x128xf32>,
    return
  }
  func.func @transform_0(%arg0: i32) -> (i32, i32) {
    %c0_i32 = arith.constant 0 : i32
    %c0_i32_0 = arith.constant 0 : i32
    return %arg0, %c0_i32 : i32, i32
  }
  func.func @transform_1(%arg0: i32) -> (i32, i32) {
    %c0_i32 = arith.constant 0 : i32
    %c0_i32_0 = arith.constant 0 : i32
    %c0_i32_1 = arith.constant 0 : i32
    return %c0_i32, %c0_i32_0 : i32, i32
  }
  func.func @transform_2(%arg0: i32) -> (i32, i32) {
    %c0_i32 = arith.constant 0 : i32
    %c0_i32_0 = arith.constant 0 : i32
    %c0_i32_1 = arith.constant 0 : i32
    return %c0_i32, %c0_i32_0 : i32, i32
  }
  func.func @transform_3(%arg0: i32) -> (i32, i32) {
    %c0_i32 = arith.constant 0 : i32
    %c0_i32_0 = arith.constant 0 : i32
    %c0_i32_1 = arith.constant 0 : i32
    return %c0_i32, %c0_i32_0 : i32, i32
  }
  func.func @transform_4(%arg0: i32) -> (i32, i32) {
    %c0_i32 = arith.constant 0 : i32
    %c0_i32_0 = arith.constant 0 : i32
    %c0_i32_1 = arith.constant 0 : i32
    return %c0_i32, %c0_i32_0 : i32, i32
  }
  func.func @transform_5(%arg0: i32) -> (i32, i32) {
    %c0_i32 = arith.constant 0 : i32
    %c0_i32_0 = arith.constant 0 : i32
    return %arg0, %c0_i32 : i32, i32
  }
}

</mosaic_0001>

<bundles_post_ra>
// kernel: tpu_custom_call.1
= control target key start
LH: loop header
LB: loop body
LE: loop exit
PB: predicated region body
PF: predicated region fallthrough
CT: control target
= control target key end

     0   :  { %10 = vsyncpa [#allocation3], 0  ;;  %s257_s0 = inlined_call_operand.vmem [shape: f32[8,2], index: 0, kind: input, shape index: {}]   ;;  %s258_s1 = inlined_call_operand.vmem [shape: f32[2,32], index: 1, kind: input, shape index: {}]   ;;  %s259_s2 = inlined_call_operand.vmem [shape: f32[1,32], index: 2, kind: input, shape index: {}]   ;;  %s260_s3 = inlined_call_operand.hbm [shape: f32[32,128], index: 3, kind: input, shape index: {}]   ;;  %s261_s4 = inlined_call_operand.vmem [shape: f32[1,128], index: 4, kind: input, shape index: {}]   ;;  %s262_s5 = inlined_call_operand.hbm [shape: f32[8,128], index: 5, kind: output, shape index: {}]  }
   0x1   :  { %11 = vsyncpa [#allocation4], 0  ;;  %s22_s20 = sshll.u32 %s260_s3, 4  ;;  %s200_s21 = smov [#allocation2]   ;;  %s23_s20 = int_to_ptr.hbm [resolvable:$true] %s22_s20 }
   0x2   :  { %s24_s22 = sshll.u32 %s200_s21, 4  ;;  %s201_s23 = smov 128   ;;  %s25_s22 = int_to_ptr.vmem [resolvable:$true] %s24_s22 }
   0x3   :  { %s202_s24 = smov 8  }
   0x4   :  { %30 = dma.hbm_to_vmem [thread:$0]  %s23_s20, 512, %s25_s22, [#allocation3], %s201_s23, %s201_s23, %s202_s24  }
   0x5   :  { %196 = dma.done.wait [#allocation3], 512  }
   0x6   :  { %197 = vsyncadd [#allocation3], 4294966784  ;;  %v203_v0 = vmov 0   ;;  %v37_v1 = vld [vmem:[%s257_s0] sm:$0xff]  ;;  %v204_v2 = vmov 1   ;;  %v63_v3 = vld [vmem:[#allocation2 + $0x18] sm:$0xff] }
   0x7   :  { %136 = vset.pattern.permute.xlu0 %v203_v0  ;;  %84 = vmatpush.msra.mxu0 %v63_v3  ;;  %v62_v4 = vld [vmem:[#allocation2 + $0x10] sm:$0xff]  ;;  %v61_v5 = vld [vmem:[#allocation2 + $0x8] sm:$0xff]  ;;  %v60_v6 = vld [vmem:[#allocation2] sm:$0xff]  ;;  %vm68_vm0 = vcmask 261120  }
   0x8   :  { %41 = vperm.xlu0 %136, %v37_v1   ;;  %v138_v8 = vld [vmem:[%s258_s1] ss:$0 sm:$0xff]  ;;  %v140_v11 = vld [vmem:[%s258_s1 + $0x1] ss:$0 sm:$0xff]  ;;  %s205_s1 = smov [#allocation5]  }
   0x9   :  { %85 = vmatpush.msra.mxu0 %v62_v4  ;;  %v139_v9 = vld [vmem:[%s259_s2] ss:$0 sm:$0xff]  ;;  %s117_s2 = sshll.u32 %s205_s1, 4  ;;  %s118_s2 = int_to_ptr.vmem [resolvable:$true] %s117_s2 }
   0xa   :  { %v141_v17 = vld [vmem:[%s261_s4] ss:$0 sm:$0xff]  ;;  %s119_s4 = sshll.u32 %s262_s5, 4  ;;  %s120_s4 = int_to_ptr.hbm [resolvable:$true] %s119_s4 }
   0xb   :  { %86 = vmatpush.msra.mxu0 %v61_v5 }
   0xd   :  { %87 = vmatpush.msra.mxu0 %v60_v6 }
  0x10   :  { %137 = vset.pattern.permute.xlu0 %v204_v2 }
  0x11   :  { %53 = vperm.xlu0 %137, %v37_v1  }
  0x7a   :  { %v42_v7 = vpop.permute.xlu0 %41 }
  0x7b   :  { %v45_v10 = vmul.f32 %v138_v8, %v42_v7 }
  0x7d   :  { %v50_v13 = vadd.f32 %v139_v9, %v45_v10 }
  0x83   :  { %v54_v12 = vpop.permute.xlu0 %53 }
  0x84   :  { %v57_v14 = vmul.f32 %v140_v11, %v54_v12 }
  0x86   :  { %v58_v15 = vadd.f32 %v57_v14, %v50_v13 }
  0x88   :  { %142 = vtanh.f32 %v58_v15 }
  0x8e   :  { %v143_v16 = vpop.eup %142 }
  0x8f   :  { %129 = vmatmul.msk.f32.vlgmr.msra.gmra.mxu0 %vm68_vm0, %v143_v16 }
 0x10c   :  { %v89_v18 = vpop.f32.mrf.mxu0 }
 0x10d   :  { %v90_v19 = vadd.f32 %v141_v17, %v89_v18 }
 0x10f   :  { %v92_v20 = vsub.f32 0.0, %v90_v19 }
 0x111   :  { %v93_v21 = vmul.f32 1.442695, %v92_v20 }
 0x113   :  { %144 = vpow2.f32 %v93_v21 }
 0x119   :  { %v145_v22 = vpop.eup %144 }
 0x11a   :  { %v95_v23 = vadd.f32 1.0, %v145_v22 }
 0x11c   :  { %146 = vrcp.f32 %v95_v23  ;;  %v107_v27 = vand.u32 2147483648, %v95_v23  ;;  %v105_v29 = vand.u32 2147483647, %v95_v23  ;;  %vm101_vm2 = vweird.f32 %v95_v23 }
 0x11e   :  { %v108_v31 = vor.u32 1.1754944e-38, %v107_v27  ;;  %vm106_vm4 = vcmp.eq.f32.partialorder %v105_v29, 8.507059e+37 }
 0x122   :  { %v147_v24 = vpop.eup %146 }
 0x123   :  { %v97_v25 = vmul.f32 %v147_v24, %v95_v23  ;;  %vm102_vm1 = vweird.f32 %v147_v24 }
 0x124   :  { %vm103_vm3 = vmor %vm101_vm2, %vm102_vm1 }
 0x125   :  { %v98_v26 = vsub.f32 1.0, %v97_v25 }
 0x127   :  { %v99_v28 = vmul.f32 %v147_v24, %v98_v26 }
 0x129   :  { %v100_v30 = vadd.f32 %v147_v24, %v99_v28 }
 0x12b   :  { %v104_v32 = vsel %vm103_vm3, %v147_v24, %v100_v30 }
 0x12c   :  { %v109_v33 = vsel %vm106_vm4, %v108_v31, %v104_v32 }
 0x12d   :  { %111 = vst [vmem:[#allocation5] sm:$0xff] %v109_v33 }
 0x12e   :  { %122 = dma.vmem_to_hbm [thread:$0]  %s118_s2, 128, %s120_s4, [#allocation4]  }
 0x12f   :  { %198 = dma.done.wait [#allocation4], 128  }
 0x130   :  { %199 = vsyncadd [#allocation4], 4294967168 }
 0x131   :  { %127 = vsyncpa [#allocation3], 1 }
 0x132   :  { %128 = vsyncpa [#allocation4], 1 }

</bundles_post_ra>
